<compile_context>
chip_gen: v6e
topology: v6e:2x2x1
jax: 0.10.0
libtpu: 0.0.40
codegen_flags: <defaults>
</compile_context>

<pallas_src>
import functools

import jax
import jax.numpy as jnp
from jax.experimental import pallas as pl
from jax.experimental.pallas import tpu as pltpu

INPUT_SIZE = 28 * 28   # 784
HIDDEN_SIZE = 100
NUM_CLASSES = 10

# Lane-padded sizes used inside the kernel path.
IN_PAD = 896           # 7 * 128
HID_PAD = 128
OUT_PAD = 128

TILE_B = 256           # default batch tile for large batches


def _round_up(x, m):
    return ((x + m - 1) // m) * m


def mlp_kernel(x_ref, w1_ref, b1_ref, w2_ref, b2_ref, out_ref):
    # Layer 1: (tile_b, 896) @ (896, 128) + (1, 128); padded cols are exact zeros.
    h = jnp.dot(x_ref[...], w1_ref[...], preferred_element_type=jnp.float32)
    h = jnp.maximum(h + b1_ref[...], 0.0)
    # Layer 2: (tile_b, 128) @ (128, 128) + (1, 128)
    o = jnp.dot(h, w2_ref[...], preferred_element_type=jnp.float32)
    out_ref[...] = (o + b2_ref[...]).astype(out_ref.dtype)


@functools.partial(jax.jit, static_argnames=("tile_b",))
def neural_net_forward(x, w1, b1, w2, b2, *, tile_b=None):
    """x: (B, 784) f32; w1: (784, 100); b1: (100,); w2: (100, 10); b2: (10,).

    Returns logits (B, 10) == relu(x @ w1 + b1) @ w2 + b2 (up to f32 rounding).
    """
    B = x.shape[0]
    if tile_b is None:
        tile_b = min(TILE_B, _round_up(B, 8))   # sublane-aligned, no giant padding for tiny B
    num_tiles = pl.cdiv(B, tile_b)
    B_pad = num_tiles * tile_b

    # --- wrapper-side zero padding (outside the kernel hot path) ---
    x_p = jnp.zeros((B_pad, IN_PAD), jnp.float32).at[:B, :INPUT_SIZE].set(x)
    w1_p = jnp.zeros((IN_PAD, HID_PAD), jnp.float32).at[:INPUT_SIZE, :HIDDEN_SIZE].set(w1)
    b1_p = jnp.zeros((1, HID_PAD), jnp.float32).at[0, :HIDDEN_SIZE].set(b1)
    w2_p = jnp.zeros((HID_PAD, OUT_PAD), jnp.float32).at[:HIDDEN_SIZE, :NUM_CLASSES].set(w2)
    b2_p = jnp.zeros((1, OUT_PAD), jnp.float32).at[0, :NUM_CLASSES].set(b2)

    flops = 2 * B_pad * IN_PAD * HID_PAD + 2 * B_pad * HID_PAD * OUT_PAD
    bytes_accessed = 4 * (
        B_pad * IN_PAD + IN_PAD * HID_PAD + HID_PAD
        + HID_PAD * OUT_PAD + OUT_PAD + B_pad * OUT_PAD
    )

    out_padded = pl.pallas_call(
        mlp_kernel,
        out_shape=jax.ShapeDtypeStruct((B_pad, OUT_PAD), jnp.float32),
        grid_spec=pltpu.PrefetchScalarGridSpec(
            num_scalar_prefetch=0,
            grid=(num_tiles,),
            in_specs=[
                # x: tiled over batch -> pipelined DMA (double-buffered)
                pl.BlockSpec((tile_b, IN_PAD), lambda i: (i, 0)),
                # weights / biases: same block every step -> VMEM-resident, no re-fetch
                pl.BlockSpec((IN_PAD, HID_PAD), lambda i: (0, 0)),
                pl.BlockSpec((1, HID_PAD), lambda i: (0, 0)),
                pl.BlockSpec((HID_PAD, OUT_PAD), lambda i: (0, 0)),
                pl.BlockSpec((1, OUT_PAD), lambda i: (0, 0)),
            ],
            out_specs=pl.BlockSpec((tile_b, OUT_PAD), lambda i: (i, 0)),
        ),
        compiler_params=pltpu.CompilerParams(
            dimension_semantics=("parallel",),      # megacore sharding on v7x
            vmem_limit_bytes=32 * 1024 * 1024,      # plenty; safe on v5e/v6e/v7x
        ),
        cost_estimate=pl.CostEstimate(
            flops=flops, transcendentals=0, bytes_accessed=bytes_accessed),
    )(x_p, w1_p, b1_p, w2_p, b2_p)

    # Strip batch and lane padding.
    return out_padded[:B, :NUM_CLASSES]


def init_params(key):
    """Parameter init mimicking nn.Linear's uniform(-1/sqrt(fan_in), 1/sqrt(fan_in))."""
    k1, k2, k3, k4 = jax.random.split(key, 4)
    bound1 = 1.0 / (INPUT_SIZE ** 0.5)
    bound2 = 1.0 / (HIDDEN_SIZE ** 0.5)
    # Stored already transposed to (in, out) for the kernel.
    w1 = jax.random.uniform(k1, (INPUT_SIZE, HIDDEN_SIZE), jnp.float32,
                            minval=-bound1, maxval=bound1)
    b1 = jax.random.uniform(k2, (HIDDEN_SIZE,), jnp.float32,
                            minval=-bound1, maxval=bound1)
    w2 = jax.random.uniform(k3, (HIDDEN_SIZE, NUM_CLASSES), jnp.float32,
                            minval=-bound2, maxval=bound2)
    b2 = jax.random.uniform(k4, (NUM_CLASSES,), jnp.float32,
                            minval=-bound2, maxval=bound2)
    return w1, b1, w2, b2


if __name__ == "__main__":
    key = jax.random.PRNGKey(0)
    kx, kp = jax.random.split(key)

    B = 8  # small example batch (padded to an 8-aligned tile inside the wrapper)
    x = jax.random.normal(kx, (B, INPUT_SIZE), dtype=jnp.float32)
    w1, b1, w2, b2 = init_params(kp)

    out = neural_net_forward(x, w1, b1, w2, b2)
    out = jax.block_until_ready(out)

    # Pure-JAX reference of the same forward pass.
    ref = jnp.maximum(x @ w1 + b1, 0.0) @ w2 + b2
    assert out.shape == (B, NUM_CLASSES)
    assert jnp.allclose(out, ref, atol=1e-4, rtol=1e-4)

    print("KERNEL_OK")
</pallas_src>

<mosaic_0001>
module attributes {stable_mosaic.version = 11 : i64} {
  func.func @mlp_kernel(%arg0: i32, %arg1: memref<8x896xf32, #tpu.memory_space<vmem>>, %arg2: memref<896x128xf32, #tpu.memory_space<vmem>>, %arg3: memref<1x128xf32, #tpu.memory_space<vmem>>, %arg4: memref<128x128xf32, #tpu.memory_space<vmem>>, %arg5: memref<1x128xf32, #tpu.memory_space<vmem>>, %arg6: memref<8x128xf32, #tpu.memory_space<vmem>>) attributes {dimension_semantics = [#tpu.dimension_semantics<parallel>], iteration_bounds = array<i64: 1>, scalar_prefetch = 0 : i64, scratch_operands = 0 : i64, tpu.core_type = #tpu.core_type<tc>, window_params = [{transform_indices = @transform_0, window_bounds = array<i64: 8, 896>}, {pipeline_mode = #tpu.pipeline_mode<synchronous>, transform_indices = @transform_1, window_bounds = array<i64: 896, 128>}, {pipeline_mode = #tpu.pipeline_mode<synchronous>, transform_indices = @transform_2, window_bounds = array<i64: 1, 128>}, {pipeline_mode = #tpu.pipeline_mode<synchronous>, transform_indices = @transform_3, window_bounds = array<i64: 128, 128>}, {pipeline_mode = #tpu.pipeline_mode<synchronous>, transform_indices = @transform_4, window_bounds = array<i64: 1, 128>}, {transform_indices = @transform_5, window_bounds = array<i64: 8, 128>}]} {
    %c0 = arith.constant 0 : index
    %c0_0 = arith.constant 0 : index
    %0 = vector.load %arg1[%c0, %c0_0] : memref<8x896xf32, #tpu.memory_space<vmem>>, vector<8x896xf32>
    %c0_1 = arith.constant 0 : index
    %c0_2 = arith.constant 0 : index
    %1 = vector.load %arg2[%c0_1, %c0_2] : memref<896x128xf32, #tpu.memory_space<vmem>>, vector<896x128xf32>
    %cst = arith.constant dense<0.000000e+00> : vector<8x128xf32>
    %2 = tpu.matmul %0, %1, %cst {dimension_numbers = #tpu.dot_dimension_numbers<[1], [0], [0], [1], [0, 0, 1, 1], [], []>} : vector<8x896xf32>, vector<896x128xf32>, vector<8x128xf32> -> vector<8x128xf32>
    %c0_3 = arith.constant 0 : index
    %c0_4 = arith.constant 0 : index
    %3 = vector.load %arg3[%c0_3, %c0_4] : memref<1x128xf32, #tpu.memory_space<vmem>>, vector<1x128xf32>
    %4 = vector.broadcast %3 : vector<1x128xf32> to vector<8x128xf32>
    %5 = arith.addf %2, %4 : vector<8x128xf32>
    %cst_5 = arith.constant 0.000000e+00 : f32
    %6 = vector.broadcast %cst_5 : f32 to vector<8x128xf32>
    %7 = arith.maximumf %5, %6 : vector<8x128xf32>
    %c0_6 = arith.constant 0 : index
    %c0_7 = arith.constant 0 : index
    %8 = vector.load %arg4[%c0_6, %c0_7] : memref<128x128xf32, #tpu.memory_space<vmem>>, vector<128x128xf32>
    %cst_8 = arith.constant dense<0.000000e+00> : vector<8x128xf32>
    %9 = tpu.matmul %7, %8, %cst_8 {dimension_numbers = #tpu.dot_dimension_numbers<[1], [0], [0], [1], [0, 0, 1, 1], [], []>} : vector<8x128xf32>, vector<128x128xf32>, vector<8x128xf32> -> vector<8x128xf32>
    %c0_9 = arith.constant 0 : index
    %c0_10 = arith.constant 0 : index
    %10 = vector.load %arg5[%c0_9, %c0_10] : memref<1x128xf32, #tpu.memory_space<vmem>>, vector<1x128xf32>
    %11 = vector.broadcast %10 : vector<1x128xf32> to vector<8x128xf32>
    %12 = arith.addf %9, %11 : vector<8x128xf32>
    %c0_11 = arith.constant 0 : index
    %c0_12 = arith.constant 0 : index
    %13 = vector.load %arg6[%c0_11, %c0_12] : memref<8x128xf32, #tpu.memory_space<vmem>>, vector<8x128xf32>
    tpu.vector_store %arg6[%c0_11, %c0_12], %12 {strides = array<i32>} : memref<8x128xf32, #tpu.memory_space<vmem>>, vector<8x128xf32>,
    return
  }
  func.func @transform_0(%arg0: i32) -> (i32, i32) {
    %c0_i32 = arith.constant 0 : i32
    %c0_i32_0 = arith.constant 0 : i32
    return %arg0, %c0_i32 : i32, i32
  }
  func.func @transform_1(%arg0: i32) -> (i32, i32) {
    %c0_i32 = arith.constant 0 : i32
    %c0_i32_0 = arith.constant 0 : i32
    %c0_i32_1 = arith.constant 0 : i32
    return %c0_i32, %c0_i32_0 : i32, i32
  }
  func.func @transform_2(%arg0: i32) -> (i32, i32) {
    %c0_i32 = arith.constant 0 : i32
    %c0_i32_0 = arith.constant 0 : i32
    %c0_i32_1 = arith.constant 0 : i32
    return %c0_i32, %c0_i32_0 : i32, i32
  }
  func.func @transform_3(%arg0: i32) -> (i32, i32) {
    %c0_i32 = arith.constant 0 : i32
    %c0_i32_0 = arith.constant 0 : i32
    %c0_i32_1 = arith.constant 0 : i32
    return %c0_i32, %c0_i32_0 : i32, i32
  }
  func.func @transform_4(%arg0: i32) -> (i32, i32) {
    %c0_i32 = arith.constant 0 : i32
    %c0_i32_0 = arith.constant 0 : i32
    %c0_i32_1 = arith.constant 0 : i32
    return %c0_i32, %c0_i32_0 : i32, i32
  }
  func.func @transform_5(%arg0: i32) -> (i32, i32) {
    %c0_i32 = arith.constant 0 : i32
    %c0_i32_0 = arith.constant 0 : i32
    return %arg0, %c0_i32 : i32, i32
  }
}

</mosaic_0001>

<bundles_post_ra>
// kernel: neural_net_forward.1
= control target key start
LH: loop header
LB: loop body
LE: loop exit
PB: predicated region body
PF: predicated region fallthrough
CT: control target
= control target key end

     0   :  { %s1253_s0 = inlined_call_operand.vmem [shape: f32[8,896], index: 0, kind: input, shape index: {}]   ;;  %s1254_s1 = inlined_call_operand.vmem [shape: f32[896,128], index: 1, kind: input, shape index: {}]   ;;  %s1255_s2 = inlined_call_operand.vmem [shape: f32[1,128], index: 2, kind: input, shape index: {}]   ;;  %s1256_s3 = inlined_call_operand.vmem [shape: f32[128,128], index: 3, kind: input, shape index: {}]   ;;  %s1257_s4 = inlined_call_operand.vmem [shape: f32[1,128], index: 4, kind: input, shape index: {}]   ;;  %s1258_s5 = inlined_call_operand.hbm [shape: f32[8,128], index: 5, kind: output, shape index: {}]  }
   0x1   :  { %v59_v0 = vld [vmem:[%s1254_s1 + $0xf8] sm:$0xff]  ;;  %v58_v2 = vld [vmem:[%s1254_s1 + $0xf0] sm:$0xff]  ;;  %v57_v6 = vld [vmem:[%s1254_s1 + $0xe8] sm:$0xff] }
   0x2   :  { %v43_v1 = vld [vmem:[%s1254_s1 + $0x78] sm:$0xff]  ;;  %538 = vmatprep.subr.mxu0 %v59_v0  ;;  %v42_v4 = vld [vmem:[%s1254_s1 + $0x70] sm:$0xff]  ;;  %v41_v8 = vld [vmem:[%s1254_s1 + $0x68] sm:$0xff] }
   0x3   :  { %v91_v3 = vld [vmem:[%s1254_s1 + $0x1f8] sm:$0xff]  ;;  %539 = vmatpush3.msra.mxu0 %v43_v1  ;;  %v90_v7 = vld [vmem:[%s1254_s1 + $0x1f0] sm:$0xff]  ;;  %v89_v10 = vld [vmem:[%s1254_s1 + $0x1e8] sm:$0xff] }
   0x4   :  { %v75_v5 = vld [vmem:[%s1254_s1 + $0x178] sm:$0xff]  ;;  %573 = vmatprep.subr.mxu1 %v91_v3  ;;  %540 = vmatprep.subr.mxu0 %v58_v2  ;;  %v74_v9 = vld [vmem:[%s1254_s1 + $0x170] sm:$0xff]  ;;  %v56_v11 = vld [vmem:[%s1254_s1 + $0xe0] sm:$0xff] }
   0x5   :  { %574 = vmatpush3.msra.mxu1 %v75_v5  ;;  %541 = vmatpush3.msra.mxu0 %v42_v4  ;;  %v73_v12 = vld [vmem:[%s1254_s1 + $0x168] sm:$0xff]  ;;  %v40_v13 = vld [vmem:[%s1254_s1 + $0x60] sm:$0xff]  ;;  %v55_v15 = vld [vmem:[%s1254_s1 + $0xd8] sm:$0xff] }
   0x6   :  { %575 = vmatprep.subr.mxu1 %v90_v7  ;;  %542 = vmatprep.subr.mxu0 %v57_v6  ;;  %v88_v14 = vld [vmem:[%s1254_s1 + $0x1e0] sm:$0xff]  ;;  %v39_v17 = vld [vmem:[%s1254_s1 + $0x58] sm:$0xff]  ;;  %v54_v19 = vld [vmem:[%s1254_s1 + $0xd0] sm:$0xff] }
   0x7   :  { %576 = vmatpush3.msra.mxu1 %v74_v9  ;;  %543 = vmatpush3.msra.mxu0 %v41_v8  ;;  %v72_v16 = vld [vmem:[%s1254_s1 + $0x160] sm:$0xff]  ;;  %v87_v18 = vld [vmem:[%s1254_s1 + $0x1d8] sm:$0xff]  ;;  %v38_v21 = vld [vmem:[%s1254_s1 + $0x50] sm:$0xff] }
   0x8   :  { %577 = vmatprep.subr.mxu1 %v89_v10  ;;  %544 = vmatprep.subr.mxu0 %v56_v11  ;;  %v71_v20 = vld [vmem:[%s1254_s1 + $0x158] sm:$0xff]  ;;  %v86_v22 = vld [vmem:[%s1254_s1 + $0x1d0] sm:$0xff]  ;;  %v53_v23 = vld [vmem:[%s1254_s1 + $0xc8] sm:$0xff]  ;;  %v772_v11 = vmov 0.0  }
   0x9   :  { %578 = vmatpush3.msra.mxu1 %v73_v12  ;;  %545 = vmatpush3.msra.mxu0 %v40_v13  ;;  %v70_v24 = vld [vmem:[%s1254_s1 + $0x150] sm:$0xff]  ;;  %v37_v25 = vld [vmem:[%s1254_s1 + $0x48] sm:$0xff]  ;;  %v52_v27 = vld [vmem:[%s1254_s1 + $0xc0] sm:$0xff] }
   0xa   :  { %579 = vmatprep.subr.mxu1 %v88_v14  ;;  %546 = vmatprep.subr.mxu0 %v55_v15  ;;  %v85_v26 = vld [vmem:[%s1254_s1 + $0x1c8] sm:$0xff]  ;;  %v36_v29 = vld [vmem:[%s1254_s1 + $0x40] sm:$0xff]  ;;  %v51_v31 = vld [vmem:[%s1254_s1 + $0xb8] sm:$0xff] }
   0xb   :  { %580 = vmatpush3.msra.mxu1 %v72_v16  ;;  %547 = vmatpush3.msra.mxu0 %v39_v17  ;;  %v69_v28 = vld [vmem:[%s1254_s1 + $0x148] sm:$0xff]  ;;  %v84_v30 = vld [vmem:[%s1254_s1 + $0x1c0] sm:$0xff]  ;;  %v35_v33 = vld [vmem:[%s1254_s1 + $0x38] sm:$0xff] }
   0xc   :  { %581 = vmatprep.subr.mxu1 %v87_v18  ;;  %548 = vmatprep.subr.mxu0 %v54_v19  ;;  %v68_v32 = vld [vmem:[%s1254_s1 + $0x140] sm:$0xff]  ;;  %v83_v34 = vld [vmem:[%s1254_s1 + $0x1b8] sm:$0xff]  ;;  %v50_v35 = vld [vmem:[%s1254_s1 + $0xb0] sm:$0xff] }
   0xd   :  { %582 = vmatpush3.msra.mxu1 %v71_v20  ;;  %549 = vmatpush3.msra.mxu0 %v38_v21  ;;  %v67_v36 = vld [vmem:[%s1254_s1 + $0x138] sm:$0xff]  ;;  %v34_v37 = vld [vmem:[%s1254_s1 + $0x30] sm:$0xff]  ;;  %v49_v39 = vld [vmem:[%s1254_s1 + $0xa8] sm:$0xff] }
   0xe   :  { %583 = vmatprep.subr.mxu1 %v86_v22  ;;  %550 = vmatprep.subr.mxu0 %v53_v23  ;;  %v82_v38 = vld [vmem:[%s1254_s1 + $0x1b0] sm:$0xff]  ;;  %v33_v41 = vld [vmem:[%s1254_s1 + $0x28] sm:$0xff]  ;;  %v48_v43 = vld [vmem:[%s1254_s1 + $0xa0] sm:$0xff] }
   0xf   :  { %584 = vmatpush3.msra.mxu1 %v70_v24  ;;  %551 = vmatpush3.msra.mxu0 %v37_v25  ;;  %v66_v40 = vld [vmem:[%s1254_s1 + $0x130] sm:$0xff]  ;;  %v81_v42 = vld [vmem:[%s1254_s1 + $0x1a8] sm:$0xff]  ;;  %v32_v45 = vld [vmem:[%s1254_s1 + $0x20] sm:$0xff] }
  0x10   :  { %585 = vmatprep.subr.mxu1 %v85_v26  ;;  %552 = vmatprep.subr.mxu0 %v52_v27  ;;  %v65_v44 = vld [vmem:[%s1254_s1 + $0x128] sm:$0xff]  ;;  %v80_v46 = vld [vmem:[%s1254_s1 + $0x1a0] sm:$0xff]  ;;  %v47_v47 = vld [vmem:[%s1254_s1 + $0x98] sm:$0xff] }
  0x11   :  { %586 = vmatpush3.msra.mxu1 %v69_v28  ;;  %553 = vmatpush3.msra.mxu0 %v36_v29  ;;  %v64_v48 = vld [vmem:[%s1254_s1 + $0x120] sm:$0xff]  ;;  %v31_v49 = vld [vmem:[%s1254_s1 + $0x18] sm:$0xff]  ;;  %v46_v51 = vld [vmem:[%s1254_s1 + $0x90] sm:$0xff] }
  0x12   :  { %587 = vmatprep.subr.mxu1 %v84_v30  ;;  %554 = vmatprep.subr.mxu0 %v51_v31  ;;  %v79_v50 = vld [vmem:[%s1254_s1 + $0x198] sm:$0xff]  ;;  %v30_v53 = vld [vmem:[%s1254_s1 + $0x10] sm:$0xff]  ;;  %v45_v55 = vld [vmem:[%s1254_s1 + $0x88] sm:$0xff] }
  0x13   :  { %588 = vmatpush3.msra.mxu1 %v68_v32  ;;  %555 = vmatpush3.msra.mxu0 %v35_v33  ;;  %v63_v52 = vld [vmem:[%s1254_s1 + $0x118] sm:$0xff]  ;;  %v78_v54 = vld [vmem:[%s1254_s1 + $0x190] sm:$0xff]  ;;  %v29_v57 = vld [vmem:[%s1254_s1 + $0x8] sm:$0xff] }
  0x14   :  { %589 = vmatprep.subr.mxu1 %v83_v34  ;;  %556 = vmatprep.subr.mxu0 %v50_v35  ;;  %v62_v56 = vld [vmem:[%s1254_s1 + $0x110] sm:$0xff]  ;;  %v77_v58 = vld [vmem:[%s1254_s1 + $0x188] sm:$0xff]  ;;  %v44_v59 = vld [vmem:[%s1254_s1 + $0x80] sm:$0xff] }
  0x15   :  { %590 = vmatpush3.msra.mxu1 %v67_v36  ;;  %557 = vmatpush3.msra.mxu0 %v34_v37  ;;  %v22_v60 = vld [vmem:[%s1253_s0 + $0x8] sm:$0xff]  ;;  %v28_v61 = vld [vmem:[%s1254_s1] sm:$0xff]  ;;  %v123_v1 = vld [vmem:[%s1254_s1 + $0x2f8] sm:$0xff] }
  0x16   :  { %591 = vmatprep.subr.mxu1 %v82_v38  ;;  %558 = vmatprep.subr.mxu0 %v49_v39  ;;  %v61_v62 = vld [vmem:[%s1254_s1 + $0x108] sm:$0xff]  ;;  %v21_v63 = vld [vmem:[%s1253_s0] sm:$0xff]  ;;  %v24_v3 = vld [vmem:[%s1253_s0 + $0x18] sm:$0xff] }
  0x17   :  { %592 = vmatpush3.msra.mxu1 %v66_v40  ;;  %559 = vmatpush3.msra.mxu0 %v33_v41  ;;  %v76_v0 = vld [vmem:[%s1254_s1 + $0x180] sm:$0xff]  ;;  %v107_v4 = vld [vmem:[%s1254_s1 + $0x278] sm:$0xff]  ;;  %v23_v5 = vld [vmem:[%s1253_s0 + $0x10] sm:$0xff] }
  0x18   :  { %593 = vmatprep.subr.mxu1 %v81_v42  ;;  %560 = vmatprep.subr.mxu0 %v48_v43  ;;  %v60_v2 = vld [vmem:[%s1254_s1 + $0x100] sm:$0xff]  ;;  %v122_v6 = vld [vmem:[%s1254_s1 + $0x2f0] sm:$0xff]  ;;  %v121_v8 = vld [vmem:[%s1254_s1 + $0x2e8] sm:$0xff] }
  0x19   :  { %594 = vmatpush3.msra.mxu1 %v65_v44  ;;  %561 = vmatpush3.msra.mxu0 %v32_v45  ;;  %v106_v7 = vld [vmem:[%s1254_s1 + $0x270] sm:$0xff]  ;;  %v139_v9 = vld [vmem:[%s1254_s1 + $0x378] sm:$0xff]  ;;  %v105_v10 = vld [vmem:[%s1254_s1 + $0x268] sm:$0xff] }
  0x1a   :  { %595 = vmatprep.subr.mxu1 %v80_v46  ;;  %562 = vmatprep.subr.mxu0 %v47_v47  ;;  %v120_v12 = vld [vmem:[%s1254_s1 + $0x2e0] sm:$0xff]  ;;  %v138_v13 = vld [vmem:[%s1254_s1 + $0x370] sm:$0xff]  ;;  %v119_v15 = vld [vmem:[%s1254_s1 + $0x2d8] sm:$0xff] }
  0x1b   :  { %596 = vmatpush3.msra.mxu1 %v64_v48  ;;  %563 = vmatpush3.msra.mxu0 %v31_v49  ;;  %v104_v14 = vld [vmem:[%s1254_s1 + $0x260] sm:$0xff]  ;;  %v137_v16 = vld [vmem:[%s1254_s1 + $0x368] sm:$0xff] }
  0x1c   :  { %597 = vmatprep.subr.mxu1 %v79_v50  ;;  %564 = vmatprep.subr.mxu0 %v46_v51 }
  0x1d   :  { %598 = vmatpush3.msra.mxu1 %v63_v52  ;;  %565 = vmatpush3.msra.mxu0 %v30_v53 }
  0x1e   :  { %599 = vmatprep.subr.mxu1 %v78_v54  ;;  %566 = vmatprep.subr.mxu0 %v45_v55 }
  0x1f   :  { %600 = vmatpush3.msra.mxu1 %v62_v56  ;;  %567 = vmatpush3.msra.mxu0 %v29_v57 }
  0x20   :  { %601 = vmatprep.subr.mxu1 %v77_v58  ;;  %568 = vmatprep.subr.mxu0 %v44_v59 }
  0x21   :  { %211 = vmatprep.mubr.f32.mxu0 %v22_v60  ;;  %569 = vmatpush3.msra.mxu0 %v28_v61 }
  0x22   :  { %602 = vmatpush3.msra.mxu1 %v61_v62  ;;  %212 = vmatmul.mubr.f32.vlgmr.msra.gmra.mxu0 %v21_v63 }
  0x23   :  { %603 = vmatprep.subr.mxu1 %v76_v0  ;;  %608 = vmatprep.subr.mxu0 %v123_v1 }
  0x24   :  { %604 = vmatpush3.msra.mxu1 %v60_v2  ;;  %281 = vmatprep.mubr.f32.mxu1 %v24_v3 }
  0x25   :  { %609 = vmatpush3.msra.mxu0 %v107_v4  ;;  %282 = vmatmul.mubr.f32.vlgmr.msra.gmra.mxu1 %v23_v5 }
  0x26   :  { %610 = vmatprep.subr.mxu0 %v122_v6  ;;  %677 = vmatprep.subr.mxu1 %v772_v11 }
  0x27   :  { %611 = vmatpush3.msra.mxu0 %v106_v7  ;;  %678 = vmatpush3.msra.mxu1 %v139_v9 }
  0x28   :  { %612 = vmatprep.subr.mxu0 %v121_v8  ;;  %679 = vmatprep.subr.mxu1 %v772_v11 }
  0x29   :  { %613 = vmatpush3.msra.mxu0 %v105_v10 }
  0x2a   :  { %10 = vsyncpa [#allocation3], 0  ;;  %614 = vmatprep.subr.mxu0 %v120_v12  ;;  %680 = vmatpush3.msra.mxu1 %v138_v13  ;;  %v103_v17 = vld [vmem:[%s1254_s1 + $0x258] sm:$0xff]  ;;  %v118_v18 = vld [vmem:[%s1254_s1 + $0x2d0] sm:$0xff]  ;;  %vm773_vm0 = vmmov 0   ;;  %s774_s12 = smov [#allocation2]  }
  0x2b   :  { %615 = vmatpush3.msra.mxu0 %v104_v14  ;;  %681 = vmatprep.subr.mxu1 %v772_v11  ;;  %v136_v19 = vld [vmem:[%s1254_s1 + $0x360] sm:$0xff]  ;;  %v102_v20 = vld [vmem:[%s1254_s1 + $0x250] sm:$0xff]  ;;  %v117_v21 = vld [vmem:[%s1254_s1 + $0x2c8] sm:$0xff]  ;;  %s528_s13 = sshll.u32 %s774_s12, 4  ;;  %s529_s13 = int_to_ptr.vmem [resolvable:$true] %s528_s13 }
  0x2c   :  { %616 = vmatprep.subr.mxu0 %v119_v15  ;;  %682 = vmatpush3.msra.mxu1 %v137_v16  ;;  %v135_v22 = vld [vmem:[%s1254_s1 + $0x358] sm:$0xff]  ;;  %v101_v23 = vld [vmem:[%s1254_s1 + $0x248] sm:$0xff]  ;;  %v116_v24 = vld [vmem:[%s1254_s1 + $0x2c0] sm:$0xff]  ;;  %p755_p1 = scmp.lt.s32.totalorder %s529_s13, %s529_s13 }
  0x2d   :  { %617 = vmatpush3.msra.mxu0 %v103_v17  ;;  %683 = vmatprep.subr.mxu1 %v772_v11  ;;  %v134_v25 = vld [vmem:[%s1254_s1 + $0x350] sm:$0xff]  ;;  %v100_v26 = vld [vmem:[%s1254_s1 + $0x240] sm:$0xff]  ;;  %v115_v27 = vld [vmem:[%s1254_s1 + $0x2b8] sm:$0xff] }
  0x2e   :  { %618 = vmatprep.subr.mxu0 %v118_v18  ;;  %684 = vmatpush3.msra.mxu1 %v136_v19  ;;  %v133_v28 = vld [vmem:[%s1254_s1 + $0x348] sm:$0xff]  ;;  %v99_v29 = vld [vmem:[%s1254_s1 + $0x238] sm:$0xff]  ;;  %v114_v30 = vld [vmem:[%s1254_s1 + $0x2b0] sm:$0xff] }
  0x2f   :  { %619 = vmatpush3.msra.mxu0 %v102_v20  ;;  %685 = vmatprep.subr.mxu1 %v772_v11  ;;  %v132_v31 = vld [vmem:[%s1254_s1 + $0x340] sm:$0xff]  ;;  %v98_v32 = vld [vmem:[%s1254_s1 + $0x230] sm:$0xff]  ;;  %v113_v33 = vld [vmem:[%s1254_s1 + $0x2a8] sm:$0xff] }
  0x30   :  { %620 = vmatprep.subr.mxu0 %v117_v21  ;;  %686 = vmatpush3.msra.mxu1 %v135_v22  ;;  %v131_v34 = vld [vmem:[%s1254_s1 + $0x338] sm:$0xff]  ;;  %v97_v35 = vld [vmem:[%s1254_s1 + $0x228] sm:$0xff]  ;;  %v112_v36 = vld [vmem:[%s1254_s1 + $0x2a0] sm:$0xff] }
  0x31   :  { %621 = vmatpush3.msra.mxu0 %v101_v23  ;;  %687 = vmatprep.subr.mxu1 %v772_v11  ;;  %v130_v37 = vld [vmem:[%s1254_s1 + $0x330] sm:$0xff]  ;;  %v96_v38 = vld [vmem:[%s1254_s1 + $0x220] sm:$0xff]  ;;  %v111_v39 = vld [vmem:[%s1254_s1 + $0x298] sm:$0xff] }
  0x32   :  { %622 = vmatprep.subr.mxu0 %v116_v24  ;;  %688 = vmatpush3.msra.mxu1 %v134_v25  ;;  %v129_v40 = vld [vmem:[%s1254_s1 + $0x328] sm:$0xff]  ;;  %v95_v41 = vld [vmem:[%s1254_s1 + $0x218] sm:$0xff]  ;;  %v110_v42 = vld [vmem:[%s1254_s1 + $0x290] sm:$0xff] }
  0x33   :  { %623 = vmatpush3.msra.mxu0 %v100_v26  ;;  %689 = vmatprep.subr.mxu1 %v772_v11  ;;  %v128_v43 = vld [vmem:[%s1254_s1 + $0x320] sm:$0xff]  ;;  %v94_v44 = vld [vmem:[%s1254_s1 + $0x210] sm:$0xff]  ;;  %v109_v45 = vld [vmem:[%s1254_s1 + $0x288] sm:$0xff] }
  0x34   :  { %624 = vmatprep.subr.mxu0 %v115_v27  ;;  %690 = vmatpush3.msra.mxu1 %v133_v28  ;;  %v127_v46 = vld [vmem:[%s1254_s1 + $0x318] sm:$0xff]  ;;  %v93_v47 = vld [vmem:[%s1254_s1 + $0x208] sm:$0xff]  ;;  %v108_v48 = vld [vmem:[%s1254_s1 + $0x280] sm:$0xff] }
  0x35   :  { %625 = vmatpush3.msra.mxu0 %v99_v29  ;;  %691 = vmatprep.subr.mxu1 %v772_v11  ;;  %v26_v49 = vld [vmem:[%s1253_s0 + $0x28] sm:$0xff]  ;;  %v92_v50 = vld [vmem:[%s1254_s1 + $0x200] sm:$0xff]  ;;  %v126_v51 = vld [vmem:[%s1254_s1 + $0x310] sm:$0xff] }
  0x36   :  { %626 = vmatprep.subr.mxu0 %v114_v30  ;;  %692 = vmatpush3.msra.mxu1 %v132_v31  ;;  %v25_v52 = vld [vmem:[%s1253_s0 + $0x20] sm:$0xff]  ;;  %v125_v53 = vld [vmem:[%s1254_s1 + $0x308] sm:$0xff]  ;;  %v27_v55 = vld [vmem:[%s1253_s0 + $0x30] sm:$0xff] }
  0x37   :  { %627 = vmatpush3.msra.mxu0 %v98_v32  ;;  %693 = vmatprep.subr.mxu1 %v772_v11  ;;  %v124_v54 = vld [vmem:[%s1254_s1 + $0x300] sm:$0xff]  ;;  %v443_v56 = vld [vmem:[%s1256_s3 + $0x78] sm:$0xff]  ;;  %v442_v57 = vld [vmem:[%s1256_s3 + $0x70] sm:$0xff] }
  0x38   :  { %628 = vmatprep.subr.mxu0 %v113_v33  ;;  %694 = vmatpush3.msra.mxu1 %v131_v34  ;;  %v441_v58 = vld [vmem:[%s1256_s3 + $0x68] sm:$0xff]  ;;  %v440_v59 = vld [vmem:[%s1256_s3 + $0x60] sm:$0xff]  ;;  %v439_v60 = vld [vmem:[%s1256_s3 + $0x58] sm:$0xff] }
  0x39   :  { %629 = vmatpush3.msra.mxu0 %v97_v35  ;;  %695 = vmatprep.subr.mxu1 %v772_v11  ;;  %v438_v61 = vld [vmem:[%s1256_s3 + $0x50] sm:$0xff]  ;;  %v437_v62 = vld [vmem:[%s1256_s3 + $0x48] sm:$0xff]  ;;  %v436_v63 = vld [vmem:[%s1256_s3 + $0x40] sm:$0xff] }
  0x3a   :  { %630 = vmatprep.subr.mxu0 %v112_v36  ;;  %696 = vmatpush3.msra.mxu1 %v130_v37  ;;  %v435_v0 = vld [vmem:[%s1256_s3 + $0x38] sm:$0xff]  ;;  %v434_v1 = vld [vmem:[%s1256_s3 + $0x30] sm:$0xff]  ;;  %v433_v2 = vld [vmem:[%s1256_s3 + $0x28] sm:$0xff] }
  0x3b   :  { %631 = vmatpush3.msra.mxu0 %v96_v38  ;;  %697 = vmatprep.subr.mxu1 %v772_v11  ;;  %v432_v3 = vld [vmem:[%s1256_s3 + $0x20] sm:$0xff]  ;;  %v431_v4 = vld [vmem:[%s1256_s3 + $0x18] sm:$0xff]  ;;  %v430_v5 = vld [vmem:[%s1256_s3 + $0x10] sm:$0xff] }
  0x3c   :  { %632 = vmatprep.subr.mxu0 %v111_v39  ;;  %698 = vmatpush3.msra.mxu1 %v129_v40  ;;  %v429_v6 = vld [vmem:[%s1256_s3 + $0x8] sm:$0xff]  ;;  %v428_v7 = vld [vmem:[%s1256_s3] sm:$0xff] }
  0x3d   :  { %633 = vmatpush3.msra.mxu0 %v95_v41  ;;  %699 = vmatprep.subr.mxu1 %v772_v11  ;;  %v536_v13 = vld [vmem:[%s1255_s2] ss:$0 sm:$0xff]  ;;  %s750_s2 = scalar_lea.vmem %s529_s13, 128 }
  0x3e   :  { %634 = vmatprep.subr.mxu0 %v110_v42  ;;  %700 = vmatpush3.msra.mxu1 %v128_v43  ;;  %v537_v25 = vld [vmem:[%s1257_s4] ss:$0 sm:$0xff]  ;;  %p751_p0 = scmp.ne.s32.totalorder %s529_s13, %s750_s2  ;;  %p756_p2 = scmp.lt.s32.totalorder %s750_s2, %s750_s2 }
  0x3f   :  { %635 = vmatpush3.msra.mxu0 %v94_v44  ;;  %701 = vmatprep.subr.mxu1 %v772_v11 }
  0x40   :  { %636 = vmatprep.subr.mxu0 %v109_v45  ;;  %702 = vmatpush3.msra.mxu1 %v127_v46  ;;  %p757_p3 = por %p756_p2, %p755_p1 }
  0x41   :  { %637 = vmatpush3.msra.mxu0 %v93_v47  ;;  %703 = vmatprep.subr.mxu1 %v772_v11 }
  0x42   :  { %638 = vmatprep.subr.mxu0 %v108_v48  ;;  %351 = vmatprep.mubr.f32.mxu0 %v26_v49  ;;  %p758_p4 = pnand %p757_p3, %p751_p0 }
  0x43   :  { %639 = vmatpush3.msra.mxu0 %v92_v50  ;;  %704 = vmatpush3.msra.mxu1 %v126_v51 }
  0x44   :  { %352 = vmatmul.mubr.f32.vlgmr.msra.gmra.mxu0 %v25_v52  ;;  %705 = vmatprep.subr.mxu1 %v772_v11 }
  0x45   :  { %706 = vmatpush3.msra.mxu1 %v125_v53  ;;  %709 = vmatprep.mubr.msk.f32.mxu1 %vm773_vm0, %v772_v11 }
  0x46   :  { %707 = vmatprep.subr.mxu1 %v772_v11  ;;  %712 = vmatprep.subr.mxu0 %v772_v11 }
  0x47   :  { %708 = vmatpush3.msra.mxu1 %v124_v54  ;;  %744 = vmatprep.mubr.msk.f32.mxu0 %vm773_vm0, %v772_v11 }
  0x48   :  { %710 = vmatmul.mubr.f32.vlgmr.msra.gmra.mxu1 %v27_v55  ;;  %713 = vmatpush3.msra.mxu0 %v443_v56 }
  0x49   :  { %714 = vmatprep.subr.mxu0 %v772_v11 }
  0x4a   :  { %715 = vmatpush3.msra.mxu0 %v442_v57 }
  0x4b   :  { %716 = vmatprep.subr.mxu0 %v772_v11 }
  0x4c   :  { %717 = vmatpush3.msra.mxu0 %v441_v58 }
  0x4d   :  { %718 = vmatprep.subr.mxu0 %v772_v11 }
  0x4e   :  { %719 = vmatpush3.msra.mxu0 %v440_v59 }
  0x4f   :  { %720 = vmatprep.subr.mxu0 %v772_v11 }
  0x50   :  { %721 = vmatpush3.msra.mxu0 %v439_v60 }
  0x51   :  { %722 = vmatprep.subr.mxu0 %v772_v11 }
  0x52   :  { %723 = vmatpush3.msra.mxu0 %v438_v61 }
  0x53   :  { %724 = vmatprep.subr.mxu0 %v772_v11 }
  0x54   :  { %725 = vmatpush3.msra.mxu0 %v437_v62 }
  0x55   :  { %726 = vmatprep.subr.mxu0 %v772_v11 }
  0x56   :  { %727 = vmatpush3.msra.mxu0 %v436_v63 }
  0x57   :  { %728 = vmatprep.subr.mxu0 %v772_v11 }
  0x58   :  { %729 = vmatpush3.msra.mxu0 %v435_v0 }
  0x59   :  { %730 = vmatprep.subr.mxu0 %v772_v11 }
  0x5a   :  { %731 = vmatpush3.msra.mxu0 %v434_v1 }
  0x5b   :  { %732 = vmatprep.subr.mxu0 %v772_v11 }
  0x5c   :  { %733 = vmatpush3.msra.mxu0 %v433_v2 }
  0x5d   :  { %734 = vmatprep.subr.mxu0 %v772_v11 }
  0x5e   :  { %735 = vmatpush3.msra.mxu0 %v432_v3 }
  0x5f   :  { %736 = vmatprep.subr.mxu0 %v772_v11 }
  0x60   :  { %737 = vmatpush3.msra.mxu0 %v431_v4 }
  0x61   :  { %738 = vmatprep.subr.mxu0 %v772_v11 }
  0x62   :  { %739 = vmatpush3.msra.mxu0 %v430_v5 }
  0x63   :  { %740 = vmatprep.subr.mxu0 %v772_v11 }
  0x64   :  { %741 = vmatpush3.msra.mxu0 %v429_v6 }
  0x65   :  { %742 = vmatprep.subr.mxu0 %v772_v11 }
  0x66   :  { %743 = vmatpush3.msra.mxu0 %v428_v7 }
  0xe2   :  { %v570_v8 = vpop.f32.mrf.mxu0 }
  0xe4   :  { %v571_v9 = vpop.f32.mrf.mxu0 }
  0xe5   :  { %v605_v10 = vpop.f32.mrf.mxu1  ;;  %v572_v12 = vadd.f32 %v571_v9, %v570_v8 }
  0xe7   :  { %v606_v14 = vpop.f32.mrf.mxu1  ;;  %v214_v15 = vadd.f32 %v572_v12, %v536_v13 }
  0xe8   :  { %v607_v16 = vadd.f32 %v606_v14, %v605_v10 }
  0xea   :  { %v284_v19 = vadd.f32 %v607_v16, %v214_v15 }
 0x104   :  { %v640_v17 = vpop.f32.mrf.mxu0 }
 0x106   :  { %v641_v18 = vpop.f32.mrf.mxu0 }
 0x107   :  { %v642_v11 = vadd.f32 %v641_v18, %v640_v17 }
 0x108   :  { %v423_v20 = vpop.f32.mrf.mxu1 }
 0x109   :  { %v354_v21 = vadd.f32 %v642_v11, %v284_v19 }
 0x10a   :  { %v711_v22 = vpop.f32.mrf.mxu1 }
 0x10b   :  { %v424_v23 = vadd.f32 %v423_v20, %v354_v21 }
 0x10d   :  { %v427_v24 = vmax.f32 %v424_v23, 0.0 }
 0x10f   :  { %745 = vmatmul.mubr.f32.vlgmr.msra.gmra.mxu0 %v427_v24 }
 0x1cf   :  { %v517_v26 = vpop.f32.mrf.mxu0 }
 0x1d0   :  { %v518_v27 = vadd.f32 %v537_v25, %v517_v26 }
 0x1d1   :  { %v746_v28 = vpop.f32.mrf.mxu0 }
 0x1d2   :  { %521 = vst [vmem:[#allocation2] sm:$0xff] %v518_v27 }
 0x1d3   :  { %761 = shalt.err (!%p758_p4)
}
 0x1d4   :  { %531 = dma.vmem_to_hbm [thread:$0]  %s529_s13, 128, %s1258_s5, [#allocation3]  }
 0x1d5   :  { %770 = dma.done.wait [#allocation3], 128  }
 0x1d6   :  { %771 = vsyncadd [#allocation3], 4294967168 }
 0x1d7   :  { %535 = vsyncpa [#allocation3], 1 }

</bundles_post_ra>
